<compile_context>
chip_gen: v7x
topology: tpu7x:2x2x1
jax: 0.10.0
libtpu: 0.0.40
codegen_flags: <defaults>
</compile_context>

<pallas_src>
from typing import NamedTuple

import jax
import jax.numpy as jnp
from jax.experimental import pallas as pl
from jax.experimental.pallas import tpu as pltpu

_LANE = 128     # lane width: last-dim alignment for MXU / lane-dense stores
_SUBLANE = 8    # f32 sublane height: second-to-last-dim alignment


def _round_up(a: int, b: int) -> int:
    return (a + b - 1) // b * b


def _pad2(a, rows, cols):
    pr, pc = rows - a.shape[0], cols - a.shape[1]
    if pr == 0 and pc == 0:
        return a
    return jnp.pad(a, ((0, pr), (0, pc)))


def _vmem_capacity_bytes() -> int:
    """Physical VMEM per core (128 MiB on v5e/v6e, 64 MiB on v7x)."""
    try:
        cap = int(pltpu.get_tpu_info().vmem_capacity_bytes)
        if cap >= (32 << 20):
            return cap
    except Exception:  # interpret mode / query unavailable
        pass
    return 64 << 20  # conservative (v7x-sized) fallback


class Tiles(NamedTuple):
    tm: int
    tn: int
    tk: int
    n_pad: int
    k_pad: int
    vmem_limit_bytes: int


def _choose_tiles(batch: int, d_in: int, d_out: int) -> Tiles:
    cap = _vmem_capacity_bytes()
    # Keep the tiled working set well under half of physical VMEM (and never
    # above 48 MiB) so double-buffering + Mosaic internals always fit.
    budget = min(cap // 2, 48 << 20)

    # --- M tile: track the batch for small B (no padding waste, one block).
    tm = _round_up(batch, _SUBLANE) if batch <= 512 else 512
    m_blocks = _round_up(batch, tm) // tm

    # --- N tile: lane-dense, up to 512.
    tn = min(512, _round_up(d_out, _LANE))
    n_pad = _round_up(d_out, tn)

    # v7x megacore: if the parallel (M, N) grid would be a single block, split
    # N in two so both TensorCores get work (neutral on single-core v5e/v6e).
    if m_blocks == 1 and n_pad // tn == 1 and tn >= 256 and (tn // 2) % _LANE == 0:
        tn //= 2
        n_pad = _round_up(d_out, tn)

    # --- K tile: grow up to the full lane-aligned contraction so the K grid
    # axis (and its per-step accumulator RMW) disappears, as long as the
    # working set fits the budget.  4 B/elem is conservative even for bf16.
    def working_set(tk_):
        # double-buffered x / W / bias input tiles + resident output tile (x2)
        return 4 * (2 * (tm * tk_ + tk_ * tn + tn) + 2 * tm * tn)

    tk = _round_up(d_in, _LANE)
    while tk > 512 and working_set(tk) > budget:
        tk = _round_up(-(-tk // 2), _LANE)   # halve, keep lane alignment
    k_pad = _round_up(d_in, tk)

    vmem_limit = min(max(working_set(tk) + (16 << 20), 32 << 20),
                     cap - (8 << 20))
    return Tiles(tm, tn, tk, n_pad, k_pad, vmem_limit)


def _linreg_kernel(x_ref, w_ref, b_ref, o_ref):
    """One (tm, tn) output tile; accumulates in-place over the K grid axis.

    x_ref: (tm, tk)  activation tile
    w_ref: (tk, tn)  pre-transposed weight tile (W.T layout -> plain matmul)
    b_ref: (1,  tn)  bias tile (DMA'd once per output tile; k-invariant)
    o_ref: (tm, tn)  f32 output tile; its block index is k-invariant so it is
                     VMEM-resident across K and doubles as the accumulator
                     (no scratch, no final acc->out copy).
    """
    k = pl.program_id(2)
    nk = pl.num_programs(2)
    first = k == 0
    last = k == nk - 1

    partial = jnp.dot(x_ref[...], w_ref[...],
                      preferred_element_type=jnp.float32)

    @pl.when(first & last)      # common case (tk == full K): one fused store
    def _():
        o_ref[...] = (partial + b_ref[...]).astype(o_ref.dtype)

    @pl.when(first & ~last)     # first of several K steps: overwrite, no zero-init
    def _():
        o_ref[...] = partial.astype(o_ref.dtype)

    @pl.when(~first & ~last)
    def _():
        o_ref[...] = o_ref[...] + partial.astype(o_ref.dtype)

    @pl.when(~first & last)     # fused final accumulate + bias + store
    def _():
        o_ref[...] = o_ref[...] + (partial + b_ref[...]).astype(o_ref.dtype)


class LinRegParams(NamedTuple):
    w_t: jax.Array      # (K_pad, N_pad) pre-transposed, padded weight
    b: jax.Array        # (1, N_pad) padded bias (f32)
    tiles: Tiles
    d_in: int
    d_out: int


def prepare_linreg(weight, bias, *, batch_hint, compute_dtype=jnp.float32):
    """One-time (model-init) parameter prep: transpose + pad + optional cast.

    Hoisted out of the per-call path so each forward only pads/casts x.
    weight: (D_out, D_in) PyTorch layout; bias: (D_out,).
    """
    d_out, d_in = weight.shape
    tiles = _choose_tiles(batch_hint, d_in, d_out)
    w_t = _pad2(weight.T.astype(compute_dtype), tiles.k_pad, tiles.n_pad)
    b = _pad2(bias.reshape(1, d_out).astype(jnp.float32), 1, tiles.n_pad)
    return LinRegParams(w_t, b, tiles, d_in, d_out)


def linreg_apply(params: LinRegParams, x):
    """y = x @ W.T + b with pre-prepared (padded, transposed) parameters."""
    B, d_in = x.shape
    assert d_in == params.d_in
    t = params.tiles
    M = _round_up(B, t.tm)

    x_p = _pad2(x.astype(params.w_t.dtype), M, t.k_pad)

    grid = (M // t.tm, t.n_pad // t.tn, t.k_pad // t.tk)
    m_blocks, n_blocks, _ = grid

    out = pl.pallas_call(
        _linreg_kernel,
        out_shape=jax.ShapeDtypeStruct((M, t.n_pad), jnp.float32),
        grid=grid,
        in_specs=[
            pl.BlockSpec((t.tm, t.tk), lambda i, j, k: (i, k)),   # x
            # TODO(synk): sweep pipeline_mode=pl.Buffered(3) on the weight spec
            # for the small-batch weight-streaming regime on v5e/v6e.
            pl.BlockSpec((t.tk, t.tn), lambda i, j, k: (k, j)),   # W.T (K, N)
            pl.BlockSpec((1, t.tn), lambda i, j, k: (0, j)),      # bias (N only)
        ],
        out_specs=pl.BlockSpec((t.tm, t.tn), lambda i, j, k: (i, j)),
        compiler_params=pltpu.CompilerParams(
            dimension_semantics=("parallel", "parallel", "arbitrary"),
            vmem_limit_bytes=t.vmem_limit_bytes,
        ),
        cost_estimate=pl.CostEstimate(
            flops=2 * M * t.k_pad * t.n_pad,
            transcendentals=0,
            bytes_accessed=(
                x_p.dtype.itemsize * M * t.k_pad * n_blocks            # x re-fetched per N block
                + params.w_t.dtype.itemsize * t.k_pad * t.n_pad * m_blocks  # W re-fetched per M block
                + 4 * t.n_pad * m_blocks                               # bias
                + 4 * M * t.n_pad                                      # output
            ),
        ),
    )(x_p, params.w_t, params.b)

    # No-op slice when B / D_out are already tile-aligned.
    return out[:B, :params.d_out]


def linreg_forward(x, weight, bias, *, compute_dtype=jnp.float32):
    """Convenience wrapper matching nn.Linear: y = x @ weight.T + bias.

    For repeated calls, hoist prepare_linreg to model init instead.
    """
    params = prepare_linreg(weight, bias, batch_hint=x.shape[0],
                            compute_dtype=compute_dtype)
    return linreg_apply(params, x)


if __name__ == "__main__":
    key = jax.random.PRNGKey(0)
    kx, kw, kb = jax.random.split(key, 3)

    batch = 8
    input_dim = 32
    output_dim = 16

    x = jax.random.normal(kx, (batch, input_dim), dtype=jnp.float32)
    # Deterministic parameter init (Kaiming-uniform-ish like torch default).
    bound = 1.0 / float(input_dim) ** 0.5
    weight = jax.random.uniform(kw, (output_dim, input_dim),
                                minval=-bound, maxval=bound, dtype=jnp.float32)
    bias = jax.random.uniform(kb, (output_dim,),
                              minval=-bound, maxval=bound, dtype=jnp.float32)

    # Parameter prep (transpose / pad) is hoisted out of the per-call path,
    # mirroring nn.Module __init__ vs forward.
    # TODO(synk): pass compute_dtype=jnp.bfloat16 on v6e/v7x (f32 accumulate)
    # when model tolerance allows; kept f32 here to hold the 1e-5 check.
    params = prepare_linreg(weight, bias, batch_hint=batch)

    y = linreg_apply(params, x)
    jax.block_until_ready(y)

    # Sanity-check against plain JAX reference.
    y_ref = x @ weight.T + bias
    assert y.shape == (batch, output_dim)
    assert jnp.allclose(y, y_ref, atol=1e-5, rtol=1e-5)

    print("KERNEL_OK")
</pallas_src>

<mosaic_0001>
module attributes {stable_mosaic.version = 11 : i64} {
  func.func @_linreg_kernel(%arg0: i32, %arg1: i32, %arg2: i32, %arg3: memref<8x128xf32, #tpu.memory_space<vmem>>, %arg4: memref<128x128xf32, #tpu.memory_space<vmem>>, %arg5: memref<1x128xf32, #tpu.memory_space<vmem>>, %arg6: memref<8x128xf32, #tpu.memory_space<vmem>>) attributes {dimension_semantics = [#tpu.dimension_semantics<parallel>, #tpu.dimension_semantics<parallel>, #tpu.dimension_semantics<arbitrary>], iteration_bounds = array<i64: 1, 1, 1>, scalar_prefetch = 0 : i64, scratch_operands = 0 : i64, tpu.core_type = #tpu.core_type<tc>, window_params = [{transform_indices = @transform_0, window_bounds = array<i64: 8, 128>}, {transform_indices = @transform_1, window_bounds = array<i64: 128, 128>}, {transform_indices = @transform_2, window_bounds = array<i64: 1, 128>}, {transform_indices = @transform_3, window_bounds = array<i64: 8, 128>}]} {
    %c0_i32 = arith.constant 0 : i32
    %0 = arith.cmpi eq, %arg2, %c0_i32 : i32
    %c0_i32_0 = arith.constant 0 : i32
    %1 = arith.cmpi eq, %arg2, %c0_i32_0 : i32
    %c0 = arith.constant 0 : index
    %c0_1 = arith.constant 0 : index
    %2 = vector.load %arg3[%c0, %c0_1] : memref<8x128xf32, #tpu.memory_space<vmem>>, vector<8x128xf32>
    %c0_2 = arith.constant 0 : index
    %c0_3 = arith.constant 0 : index
    %3 = vector.load %arg4[%c0_2, %c0_3] : memref<128x128xf32, #tpu.memory_space<vmem>>, vector<128x128xf32>
    %cst = arith.constant dense<0.000000e+00> : vector<8x128xf32>
    %4 = tpu.matmul %2, %3, %cst {dimension_numbers = #tpu.dot_dimension_numbers<[1], [0], [0], [1], [0, 0, 1, 1], [], []>} : vector<8x128xf32>, vector<128x128xf32>, vector<8x128xf32> -> vector<8x128xf32>
    %5 = arith.andi %0, %1 : i1
    %6 = arith.extui %5 : i1 to i32
    %c0_i32_4 = arith.constant 0 : i32
    %7 = arith.cmpi ne, %6, %c0_i32_4 : i32
    scf.if %7 {
      %c0_11 = arith.constant 0 : index
      %c0_12 = arith.constant 0 : index
      %21 = vector.load %arg5[%c0_11, %c0_12] : memref<1x128xf32, #tpu.memory_space<vmem>>, vector<1x128xf32>
      %22 = vector.broadcast %21 : vector<1x128xf32> to vector<8x128xf32>
      %23 = arith.addf %4, %22 : vector<8x128xf32>
      %c0_13 = arith.constant 0 : index
      %c0_14 = arith.constant 0 : index
      %24 = vector.load %arg6[%c0_13, %c0_14] : memref<8x128xf32, #tpu.memory_space<vmem>>, vector<8x128xf32>
      tpu.vector_store %arg6[%c0_13, %c0_14], %23 {strides = array<i32>} : memref<8x128xf32, #tpu.memory_space<vmem>>, vector<8x128xf32>,
    } else {
    }
    %true = arith.constant true
    %8 = arith.xori %1, %true : i1
    %9 = arith.andi %0, %8 : i1
    %10 = arith.extui %9 : i1 to i32
    %c0_i32_5 = arith.constant 0 : i32
    %11 = arith.cmpi ne, %10, %c0_i32_5 : i32
    scf.if %11 {
      %c0_11 = arith.constant 0 : index
      %c0_12 = arith.constant 0 : index
      %21 = vector.load %arg6[%c0_11, %c0_12] : memref<8x128xf32, #tpu.memory_space<vmem>>, vector<8x128xf32>
      tpu.vector_store %arg6[%c0_11, %c0_12], %4 {strides = array<i32>} : memref<8x128xf32, #tpu.memory_space<vmem>>, vector<8x128xf32>,
    } else {
    }
    %true_6 = arith.constant true
    %12 = arith.xori %0, %true_6 : i1
    %true_7 = arith.constant true
    %13 = arith.xori %1, %true_7 : i1
    %14 = arith.andi %12, %13 : i1
    %15 = arith.extui %14 : i1 to i32
    %c0_i32_8 = arith.constant 0 : i32
    %16 = arith.cmpi ne, %15, %c0_i32_8 : i32
    scf.if %16 {
      %c0_11 = arith.constant 0 : index
      %c0_12 = arith.constant 0 : index
      %21 = vector.load %arg6[%c0_11, %c0_12] : memref<8x128xf32, #tpu.memory_space<vmem>>, vector<8x128xf32>
      %22 = arith.addf %21, %4 : vector<8x128xf32>
      %c0_13 = arith.constant 0 : index
      %c0_14 = arith.constant 0 : index
      %23 = vector.load %arg6[%c0_13, %c0_14] : memref<8x128xf32, #tpu.memory_space<vmem>>, vector<8x128xf32>
      tpu.vector_store %arg6[%c0_13, %c0_14], %22 {strides = array<i32>} : memref<8x128xf32, #tpu.memory_space<vmem>>, vector<8x128xf32>,
    } else {
    }
    %true_9 = arith.constant true
    %17 = arith.xori %0, %true_9 : i1
    %18 = arith.andi %17, %1 : i1
    %19 = arith.extui %18 : i1 to i32
    %c0_i32_10 = arith.constant 0 : i32
    %20 = arith.cmpi ne, %19, %c0_i32_10 : i32
    scf.if %20 {
      %c0_11 = arith.constant 0 : index
      %c0_12 = arith.constant 0 : index
      %21 = vector.load %arg6[%c0_11, %c0_12] : memref<8x128xf32, #tpu.memory_space<vmem>>, vector<8x128xf32>
      %c0_13 = arith.constant 0 : index
      %c0_14 = arith.constant 0 : index
      %22 = vector.load %arg5[%c0_13, %c0_14] : memref<1x128xf32, #tpu.memory_space<vmem>>, vector<1x128xf32>
      %23 = vector.broadcast %22 : vector<1x128xf32> to vector<8x128xf32>
      %24 = arith.addf %4, %23 : vector<8x128xf32>
      %25 = arith.addf %21, %24 : vector<8x128xf32>
      %c0_15 = arith.constant 0 : index
      %c0_16 = arith.constant 0 : index
      %26 = vector.load %arg6[%c0_15, %c0_16] : memref<8x128xf32, #tpu.memory_space<vmem>>, vector<8x128xf32>
      tpu.vector_store %arg6[%c0_15, %c0_16], %25 {strides = array<i32>} : memref<8x128xf32, #tpu.memory_space<vmem>>, vector<8x128xf32>,
    } else {
    }
    return
  }
  func.func @transform_0(%arg0: i32, %arg1: i32, %arg2: i32) -> (i32, i32) {
    %c0_i32 = arith.constant 0 : i32
    return %arg0, %arg2 : i32, i32
  }
  func.func @transform_1(%arg0: i32, %arg1: i32, %arg2: i32) -> (i32, i32) {
    %c0_i32 = arith.constant 0 : i32
    return %arg2, %arg1 : i32, i32
  }
  func.func @transform_2(%arg0: i32, %arg1: i32, %arg2: i32) -> (i32, i32) {
    %c0_i32 = arith.constant 0 : i32
    %c0_i32_0 = arith.constant 0 : i32
    return %c0_i32, %arg1 : i32, i32
  }
  func.func @transform_3(%arg0: i32, %arg1: i32, %arg2: i32) -> (i32, i32) {
    %c0_i32 = arith.constant 0 : i32
    return %arg0, %arg1 : i32, i32
  }
}

</mosaic_0001>

<bundles_post_ra>
// kernel: tpu_custom_call.1
= control target key start
LH: loop header
LB: loop body
LE: loop exit
PB: predicated region body
PF: predicated region fallthrough
CT: control target
= control target key end

     0   :  { %8 = vsyncpa [#allocation3], 0  ;;  %s414_s0 = inlined_call_operand.hbm [shape: f32[8,128], index: 0, kind: input, shape index: {}]   ;;  %s415_s1 = inlined_call_operand.hbm [shape: f32[128,128], index: 1, kind: input, shape index: {}]   ;;  %s416_s2 = inlined_call_operand.vmem [shape: f32[1,128], index: 2, kind: input, shape index: {}]   ;;  %s417_s3 = inlined_call_operand.hbm [shape: f32[8,128], index: 3, kind: output, shape index: {}]  }
   0x1   :  { %9 = vsyncpa [#allocation6], 0 }
   0x2   :  { %10 = vsyncpa [#allocation4], 0  ;;  %s340_s12 = smov [#allocation2]   ;;  %s341_s14 = smov [#allocation5]  }
   0x3   :  { %s17_s13 = sshll.u32 %s340_s12, 4  ;;  %s26_s15 = sshll.u32 %s341_s14, 4  ;;  %s18_s13 = int_to_ptr.vmem [resolvable:$true] %s17_s13  ;;  %s368_s15 = int_to_ptr.vmem [resolvable:$true] %s26_s15 }
   0x4   :  { %s268_s18 = scalar_lea.hbm %s414_s0, 128 }
   0x5   :  { %p269_p0 = scmp.ne.s32.totalorder %s414_s0, %s268_s18  ;;  %p272_p1 = scmp.lt.u32.totalorder %s268_s18, %s414_s0 }
   0x7   :  { %p274_p2 = pnand %p272_p1, %p269_p0 }
   0x9   :  { %277 = shalt.err (!%p274_p2)
}
   0xa   :  { %s278_s23 = scalar_lea.vmem %s18_s13, 128  ;;  %p283_p4 = scmp.lt.s32.totalorder %s18_s13, %s18_s13 }
   0xb   :  { %p279_p3 = scmp.ne.s32.totalorder %s18_s13, %s278_s23  ;;  %p284_p5 = scmp.lt.s32.totalorder %s278_s23, %s278_s23 }
   0xd   :  { %p285_p6 = por %p284_p5, %p283_p4 }
   0xf   :  { %p286_p7 = pnand %p285_p6, %p279_p3 }
  0x11   :  { %289 = shalt.err (!%p286_p7)
}
  0x12   :  { %20 = dma.hbm_to_vmem [thread:$0]  %s414_s0, 128, %s18_s13, [#allocation3]  }
  0x13   :  { %s290_s28 = scalar_lea.hbm %s415_s1, 2048 }
  0x14   :  { %p291_p8 = scmp.ne.s32.totalorder %s415_s1, %s290_s28  ;;  %p294_p9 = scmp.lt.u32.totalorder %s290_s28, %s415_s1 }
  0x16   :  { %p296_p10 = pnand %p294_p9, %p291_p8 }
  0x18   :  { %299 = shalt.err (!%p296_p10)
}
  0x19   :  { %s300_s6 = scalar_lea.vmem %s368_s15, 2048  ;;  %p305_p12 = scmp.lt.s32.totalorder %s368_s15, %s368_s15 }
  0x1a   :  { %p301_p11 = scmp.ne.s32.totalorder %s368_s15, %s300_s6  ;;  %p306_p13 = scmp.lt.s32.totalorder %s300_s6, %s300_s6 }
  0x1c   :  { %p307_p0 = por %p306_p13, %p305_p12 }
  0x1e   :  { %p308_p1 = pnand %p307_p0, %p301_p11 }
  0x20   :  { %311 = shalt.err (!%p308_p1)
}
  0x21   :  { %s342_s0 = smov 128   ;;  %s343_s7 = smov 8  }
  0x22   :  { %32 = dma.hbm_to_vmem [thread:$0]  %s415_s1, 2048, %s368_s15, [#allocation6], %s342_s0, %s342_s0, %s343_s7  }
  0x23   :  { %334 = dma.done.wait [#allocation3], 128  }
  0x24   :  { %335 = vsyncadd [#allocation3], 4294967168 }
  0x25   :  { %336 = dma.done.wait [#allocation6], 2048  }
  0x26   :  { %337 = vsyncadd [#allocation6], 4294965248  ;;  %v344_v0 = vmov 0.0|0.0   ;;  %vm345_vm0 = vmmov 0   ;;  %v346_v1 = vmov 0.0   ;;  %v43_v2 = vld [vmem:[#allocation5] sm:$0xff] }
  0x27   :  { %236 = vmatprep.subr.bf16.mxu0 %v344_v0  ;;  %233 = vmatprep.mubr.msk.f32.mxu0 %vm345_vm0, %v346_v1  ;;  %v44_v3 = vld [vmem:[#allocation5 + $0x8] sm:$0xff]  ;;  %v45_v4 = vld [vmem:[#allocation5 + $0x10] sm:$0xff]  ;;  %v46_v6 = vld [vmem:[#allocation5 + $0x18] sm:$0xff]  ;;  %s347_s11 = smov [#allocation7]  }
  0x28   :  { %v237_v5 = vpack.c.bf16 %v44_v3, %v43_v2  ;;  %v240_v7 = vpack.c.bf16 %v46_v6, %v45_v4  ;;  %v47_v8 = vld [vmem:[#allocation5 + $0x20] sm:$0xff]  ;;  %v48_v9 = vld [vmem:[#allocation5 + $0x28] sm:$0xff]  ;;  %v49_v11 = vld [vmem:[#allocation5 + $0x30] sm:$0xff]  ;;  %s172_s12 = sshll.u32 %s347_s11, 4  ;;  %s173_s12 = int_to_ptr.vmem [resolvable:$true] %s172_s12 }
  0x29   :  { %v243_v10 = vpack.c.bf16 %v48_v9, %v47_v8  ;;  %v50_v12 = vld [vmem:[#allocation5 + $0x38] sm:$0xff]  ;;  %v51_v14 = vld [vmem:[#allocation5 + $0x40] sm:$0xff]  ;;  %v52_v15 = vld [vmem:[#allocation5 + $0x48] sm:$0xff]  ;;  %s312_s13 = scalar_lea.vmem %s173_s12, 128  ;;  %p317_p3 = scmp.lt.s32.totalorder %s173_s12, %s173_s12 }
  0x2a   :  { %238 = vmatpush3.bf16.msra.mxu0 %v237_v5  ;;  %v246_v13 = vpack.c.bf16 %v50_v12, %v49_v11  ;;  %v249_v16 = vpack.c.bf16 %v52_v15, %v51_v14  ;;  %v53_v17 = vld [vmem:[#allocation5 + $0x50] sm:$0xff]  ;;  %v54_v18 = vld [vmem:[#allocation5 + $0x58] sm:$0xff]  ;;  %v55_v20 = vld [vmem:[#allocation5 + $0x60] sm:$0xff]  ;;  %p313_p2 = scmp.ne.s32.totalorder %s173_s12, %s312_s13  ;;  %p318_p4 = scmp.lt.s32.totalorder %s312_s13, %s312_s13 }
  0x2b   :  { %239 = vmatprep.subr.bf16.mxu0 %v344_v0  ;;  %v252_v19 = vpack.c.bf16 %v54_v18, %v53_v17  ;;  %v56_v21 = vld [vmem:[#allocation5 + $0x68] sm:$0xff]  ;;  %v57_v23 = vld [vmem:[#allocation5 + $0x70] sm:$0xff]  ;;  %v58_v24 = vld [vmem:[#allocation5 + $0x78] sm:$0xff] }
  0x2c   :  { %v255_v22 = vpack.c.bf16 %v56_v21, %v55_v20  ;;  %v258_v25 = vpack.c.bf16 %v58_v24, %v57_v23  ;;  %v42_v26 = vld [vmem:[#allocation2] sm:$0xff]  ;;  %p319_p5 = por %p318_p4, %p317_p3 }
  0x2d   :  { %v182_v27 = vld [vmem:[%s416_s2] ss:$0 sm:$0xff] }
  0x2e   :  { %241 = vmatpush3.bf16.msra.mxu0 %v240_v7  ;;  %p320_p6 = pnand %p319_p5, %p313_p2 }
  0x2f   :  { %242 = vmatprep.subr.bf16.mxu0 %v344_v0 }
  0x32   :  { %244 = vmatpush3.bf16.msra.mxu0 %v243_v10 }
  0x33   :  { %245 = vmatprep.subr.bf16.mxu0 %v344_v0 }
  0x36   :  { %247 = vmatpush3.bf16.msra.mxu0 %v246_v13 }
  0x37   :  { %248 = vmatprep.subr.bf16.mxu0 %v344_v0 }
  0x3a   :  { %250 = vmatpush3.bf16.msra.mxu0 %v249_v16 }
  0x3b   :  { %251 = vmatprep.subr.bf16.mxu0 %v344_v0 }
  0x3e   :  { %253 = vmatpush3.bf16.msra.mxu0 %v252_v19 }
  0x3f   :  { %254 = vmatprep.subr.bf16.mxu0 %v344_v0 }
  0x42   :  { %256 = vmatpush3.bf16.msra.mxu0 %v255_v22 }
  0x43   :  { %257 = vmatprep.subr.bf16.mxu0 %v344_v0 }
  0x46   :  { %259 = vmatpush3.bf16.msra.mxu0 %v258_v25 }
  0x49   :  { %234 = vmatmul.mubr.f32.vlgmr.msra.gmra.mrb[0].mxu0 %v42_v26 }
 0x11c   :  { %v125_v28 = vpop.f32.mrb[0].mxu0 }
 0x11d   :  { %v139_v29 = vadd.f32 %v182_v27, %v125_v28  ;;  %v235_v30 = vpop.f32.mrb[1].mxu0 }
 0x11f   :  { %140 = vst [vmem:[#allocation7] sm:$0xff] %v139_v29 }
 0x120   :  { %323 = shalt.err (!%p320_p6)
}
 0x121   :  { %s324_s16 = scalar_lea.hbm %s417_s3, 128 }
 0x122   :  { %p325_p7 = scmp.ne.s32.totalorder %s417_s3, %s324_s16  ;;  %p328_p8 = scmp.lt.u32.totalorder %s324_s16, %s417_s3 }
 0x124   :  { %p330_p9 = pnand %p328_p8, %p325_p7 }
 0x126   :  { %333 = shalt.err (!%p330_p9)
}
 0x127   :  { %175 = dma.vmem_to_hbm [thread:$0]  %s173_s12, 128, %s417_s3, [#allocation4]  }
 0x128   :  { %338 = dma.done.wait [#allocation4], 128  }
 0x129   :  { %339 = vsyncadd [#allocation4], 4294967168 }
 0x12a   :  { %179 = vsyncpa [#allocation3], 1 }
 0x12b   :  { %180 = vsyncpa [#allocation6], 1 }
 0x12c   :  { %181 = vsyncpa [#allocation4], 1 }

</bundles_post_ra>
